<compile_context>
chip_gen: v6e
topology: v6e:2x2x1
jax: 0.10.0
libtpu: 0.0.40
codegen_flags: <defaults>
</compile_context>

<pallas_src>
import jax
import jax.numpy as jnp
from jax.experimental import pallas as pl
from jax.experimental.pallas import tpu as pltpu


def _production_rule_kernel(p_ref, c_ref, emb_ref, o_ref):
    # p_ref, c_ref, o_ref : (TB, E) tiles in VMEM
    # emb_ref             : (1, E) parameter tile in VMEM (same block every step)
    p = p_ref[...].astype(jnp.float32)
    c = c_ref[...].astype(jnp.float32)
    emb = emb_ref[...].astype(jnp.float32)          # (1, E)
    o_ref[...] = (p + c * emb).astype(o_ref.dtype)  # forward = p + rule(p, c)


def _choose_tile_b(B, E, itemsize, *, vmem_budget_bytes=48 * 1024 * 1024,
                   row_cap=1024):
    """Largest batch tile that (a) keeps 6 buffered tiles inside the VMEM
    budget, (b) is a multiple of the packed sublane count for the dtype,
    (c) divides B, and (d) leaves >= 2 grid steps when B is big enough so
    both v7x TensorCores get work."""
    sublane_pack = max(8, 32 // max(1, itemsize))     # f32->8, bf16->16, int8->32
    # 3 arrays (p, c, out) x 2 buffers each:
    max_rows_by_vmem = max(sublane_pack, vmem_budget_bytes // (6 * E * itemsize))
    cap = min(row_cap, max_rows_by_vmem)
    if B >= 2 * sublane_pack:
        cap = min(cap, B // 2)                        # keep grid length >= 2
    best = None
    t = sublane_pack
    while t <= min(cap, B):
        if B % t == 0:
            best = t
        t += sublane_pack
    if best is None:
        best = B                                      # tiny/irregular batch: one full block
    return best


def production_rule_forward(var_primary, var_context, embedding, *, tile_b=None):
    """forward(p, c) = p + rule(p, c), with rule(p, c) = c * embedding."""
    B, E = var_primary.shape
    assert var_context.shape == (B, E)
    assert embedding.shape == (E,)

    itemsize = jnp.dtype(var_primary.dtype).itemsize
    if tile_b is None:
        tile_b = _choose_tile_b(B, E, itemsize)
    assert B % tile_b == 0

    emb2d = embedding.reshape(1, E)                   # 2-D parameter row for TPU layout

    # Explicit VMEM budget: double-buffered p/c/out tiles + resident embedding
    # + headroom; clamped so it never exceeds v7x's scoped/physical limits.
    tile_bytes = tile_b * E * itemsize
    emb_bytes = E * jnp.dtype(embedding.dtype).itemsize
    vmem_limit = 2 * 3 * tile_bytes + 2 * emb_bytes + (2 << 20)
    vmem_limit = int(min(max(vmem_limit, 16 << 20), 56 << 20))

    grid = (B // tile_b,)
    return pl.pallas_call(
        _production_rule_kernel,
        out_shape=jax.ShapeDtypeStruct((B, E), var_primary.dtype),
        grid=grid,
        in_specs=[
            pl.BlockSpec((tile_b, E), lambda i: (i, 0)),   # var_primary tile
            pl.BlockSpec((tile_b, E), lambda i: (i, 0)),   # var_context tile
            pl.BlockSpec((1, E), lambda i: (0, 0)),        # embedding (resident, no re-DMA)
        ],
        out_specs=pl.BlockSpec((tile_b, E), lambda i: (i, 0)),
        compiler_params=pltpu.CompilerParams(
            dimension_semantics=("parallel",),
            vmem_limit_bytes=vmem_limit,
        ),
    )(var_primary, var_context, emb2d)


if __name__ == "__main__":
    key = jax.random.PRNGKey(0)
    k_emb, k_p, k_c = jax.random.split(key, 3)

    # Small shapes consistent with the module: batch=8, embedding_size=128.
    B, E = 8, 128
    embedding = jax.random.normal(k_emb, (E,), dtype=jnp.float32)
    var_primary = jax.random.normal(k_p, (B, E), dtype=jnp.float32)
    var_context = jax.random.normal(k_c, (B, E), dtype=jnp.float32)

    out = production_rule_forward(var_primary, var_context, embedding)
    out = jax.block_until_ready(out)
    ref = var_primary + var_context * embedding[None, :]
    assert out.shape == (B, E)
    assert jnp.allclose(out, ref, atol=1e-6, rtol=1e-6)

    # Second small check that exercises a multi-step grid (tile chooser picks
    # tile_b=16 -> grid=(2,), so the "parallel" axis actually shards on v7x).
    B2 = 32
    p2 = jax.random.normal(jax.random.PRNGKey(1), (B2, E), dtype=jnp.float32)
    c2 = jax.random.normal(jax.random.PRNGKey(2), (B2, E), dtype=jnp.float32)
    out2 = jax.block_until_ready(production_rule_forward(p2, c2, embedding))
    ref2 = p2 + c2 * embedding[None, :]
    assert jnp.allclose(out2, ref2, atol=1e-6, rtol=1e-6)

    print("KERNEL_OK")
</pallas_src>

<mosaic_0001>
module attributes {stable_mosaic.version = 11 : i64} {
  func.func @_production_rule_kernel(%arg0: i32, %arg1: memref<8x128xf32, #tpu.memory_space<vmem>>, %arg2: memref<8x128xf32, #tpu.memory_space<vmem>>, %arg3: memref<1x128xf32, #tpu.memory_space<vmem>>, %arg4: memref<8x128xf32, #tpu.memory_space<vmem>>) attributes {dimension_semantics = [#tpu.dimension_semantics<parallel>], iteration_bounds = array<i64: 1>, scalar_prefetch = 0 : i64, scratch_operands = 0 : i64, tpu.core_type = #tpu.core_type<tc>, window_params = [{transform_indices = @transform_0, window_bounds = array<i64: 8, 128>}, {transform_indices = @transform_1, window_bounds = array<i64: 8, 128>}, {pipeline_mode = #tpu.pipeline_mode<synchronous>, transform_indices = @transform_2, window_bounds = array<i64: 1, 128>}, {transform_indices = @transform_3, window_bounds = array<i64: 8, 128>}]} {
    %c0 = arith.constant 0 : index
    %c0_0 = arith.constant 0 : index
    %0 = vector.load %arg1[%c0, %c0_0] : memref<8x128xf32, #tpu.memory_space<vmem>>, vector<8x128xf32>
    %c0_1 = arith.constant 0 : index
    %c0_2 = arith.constant 0 : index
    %1 = vector.load %arg2[%c0_1, %c0_2] : memref<8x128xf32, #tpu.memory_space<vmem>>, vector<8x128xf32>
    %c0_3 = arith.constant 0 : index
    %c0_4 = arith.constant 0 : index
    %2 = vector.load %arg3[%c0_3, %c0_4] : memref<1x128xf32, #tpu.memory_space<vmem>>, vector<1x128xf32>
    %3 = vector.broadcast %2 : vector<1x128xf32> to vector<8x128xf32>
    %4 = arith.mulf %1, %3 : vector<8x128xf32>
    %5 = arith.addf %0, %4 : vector<8x128xf32>
    %c0_5 = arith.constant 0 : index
    %c0_6 = arith.constant 0 : index
    %6 = vector.load %arg4[%c0_5, %c0_6] : memref<8x128xf32, #tpu.memory_space<vmem>>, vector<8x128xf32>
    tpu.vector_store %arg4[%c0_5, %c0_6], %5 {strides = array<i32>} : memref<8x128xf32, #tpu.memory_space<vmem>>, vector<8x128xf32>,
    return
  }
  func.func @transform_0(%arg0: i32) -> (i32, i32) {
    %c0_i32 = arith.constant 0 : i32
    %c0_i32_0 = arith.constant 0 : i32
    return %arg0, %c0_i32 : i32, i32
  }
  func.func @transform_1(%arg0: i32) -> (i32, i32) {
    %c0_i32 = arith.constant 0 : i32
    %c0_i32_0 = arith.constant 0 : i32
    return %arg0, %c0_i32 : i32, i32
  }
  func.func @transform_2(%arg0: i32) -> (i32, i32) {
    %c0_i32 = arith.constant 0 : i32
    %c0_i32_0 = arith.constant 0 : i32
    %c0_i32_1 = arith.constant 0 : i32
    return %c0_i32, %c0_i32_0 : i32, i32
  }
  func.func @transform_3(%arg0: i32) -> (i32, i32) {
    %c0_i32 = arith.constant 0 : i32
    %c0_i32_0 = arith.constant 0 : i32
    return %arg0, %c0_i32 : i32, i32
  }
}

</mosaic_0001>

<bundles_post_ra>
// kernel: tpu_custom_call.1
= control target key start
LH: loop header
LB: loop body
LE: loop exit
PB: predicated region body
PF: predicated region fallthrough
CT: control target
= control target key end

     0   :  { %8 = vsyncpa [#allocation3], 0  ;;  %s172_s0 = inlined_call_operand.hbm [shape: f32[8,128], index: 0, kind: input, shape index: {}]   ;;  %s173_s1 = inlined_call_operand.hbm [shape: f32[8,128], index: 1, kind: input, shape index: {}]   ;;  %s174_s2 = inlined_call_operand.vmem [shape: f32[1,128], index: 2, kind: input, shape index: {}]   ;;  %s175_s3 = inlined_call_operand.hbm [shape: f32[8,128], index: 3, kind: output, shape index: {}]  }
   0x1   :  { %9 = vsyncpa [#allocation6], 0 }
   0x2   :  { %10 = vsyncpa [#allocation4], 0  ;;  %s137_s12 = smov [#allocation2]   ;;  %s138_s14 = smov [#allocation5]  }
   0x3   :  { %s17_s13 = sshll.u32 %s137_s12, 4  ;;  %s27_s15 = sshll.u32 %s138_s14, 4  ;;  %s18_s13 = int_to_ptr.vmem [resolvable:$true] %s17_s13  ;;  %s28_s15 = int_to_ptr.vmem [resolvable:$true] %s27_s15 }
   0x4   :  { %s79_s16 = scalar_lea.vmem %s18_s13, 128  ;;  %p84_p1 = scmp.lt.s32.totalorder %s18_s13, %s18_s13 }
   0x5   :  { %p80_p0 = scmp.ne.s32.totalorder %s18_s13, %s79_s16  ;;  %p85_p2 = scmp.lt.s32.totalorder %s79_s16, %s79_s16 }
   0x7   :  { %p86_p3 = por %p85_p2, %p84_p1 }
   0x9   :  { %p87_p4 = pnand %p86_p3, %p80_p0 }
   0xb   :  { %90 = shalt.err (!%p87_p4)
}
   0xc   :  { %20 = dma.hbm_to_vmem [thread:$0]  %s172_s0, 128, %s18_s13, [#allocation3]  }
   0xd   :  { %s99_s19 = scalar_lea.vmem %s28_s15, 128  ;;  %p104_p6 = scmp.lt.s32.totalorder %s28_s15, %s28_s15 }
   0xe   :  { %p100_p5 = scmp.ne.s32.totalorder %s28_s15, %s99_s19  ;;  %p105_p7 = scmp.lt.s32.totalorder %s99_s19, %s99_s19 }
  0x10   :  { %p106_p8 = por %p105_p7, %p104_p6 }
  0x12   :  { %p107_p9 = pnand %p106_p8, %p100_p5 }
  0x14   :  { %110 = shalt.err (!%p107_p9)
}
  0x15   :  { %30 = dma.hbm_to_vmem [thread:$0]  %s173_s1, 128, %s28_s15, [#allocation6]  }
  0x16   :  { %131 = dma.done.wait [#allocation3], 128  }
  0x17   :  { %132 = vsyncadd [#allocation3], 4294967168 }
  0x18   :  { %133 = dma.done.wait [#allocation6], 128  }
  0x19   :  { %134 = vsyncadd [#allocation6], 4294967168  ;;  %v39_v0 = vld [vmem:[#allocation2] sm:$0xff]  ;;  %v40_v1 = vld [vmem:[#allocation5] sm:$0xff]  ;;  %s139_s0 = smov [#allocation7]  }
  0x1a   :  { %v67_v2 = vld [vmem:[%s174_s2] ss:$0 sm:$0xff]  ;;  %s57_s24 = sshll.u32 %s139_s0, 4  ;;  %s58_s24 = int_to_ptr.vmem [resolvable:$true] %s57_s24 }
  0x1b   :  { %v48_v3 = vmul.f32 %v67_v2, %v40_v1  ;;  %s111_s25 = scalar_lea.vmem %s58_s24, 128  ;;  %p116_p11 = scmp.lt.s32.totalorder %s58_s24, %s58_s24 }
  0x1c   :  { %p112_p10 = scmp.ne.s32.totalorder %s58_s24, %s111_s25  ;;  %p117_p12 = scmp.lt.s32.totalorder %s111_s25, %s111_s25 }
  0x1d   :  { %v49_v4 = vadd.f32 %v48_v3, %v39_v0 }
  0x1e   :  { %p118_p13 = por %p117_p12, %p116_p11 }
  0x1f   :  { %50 = vst [vmem:[#allocation7] sm:$0xff] %v49_v4 }
  0x20   :  { %p119_p0 = pnand %p118_p13, %p112_p10 }
  0x22   :  { %122 = shalt.err (!%p119_p0)
}
  0x23   :  { %60 = dma.vmem_to_hbm [thread:$0]  %s58_s24, 128, %s175_s3, [#allocation4]  }
  0x24   :  { %135 = dma.done.wait [#allocation4], 128  }
  0x25   :  { %136 = vsyncadd [#allocation4], 4294967168 }
  0x26   :  { %64 = vsyncpa [#allocation3], 1 }
  0x27   :  { %65 = vsyncpa [#allocation6], 1 }
  0x28   :  { %66 = vsyncpa [#allocation4], 1 }

</bundles_post_ra>
